<compile_context>
chip_gen: v7x
topology: tpu7x:2x2x1
jax: 0.10.0
libtpu: 0.0.40
codegen_flags: <defaults>
</compile_context>

<pallas_src>
import jax
import jax.numpy as jnp
from jax.experimental import pallas as pl
from jax.experimental.pallas import tpu as pltpu


def _mf_kernel(uid_ref, iid_ref, uemb_ref, iemb_ref, out_ref):
    # uid_ref, iid_ref : (1, TB) int32 id tiles
    # uemb_ref         : (U, F)  full user-embedding table (VMEM-resident)
    # iemb_ref         : (I, F)  full item-embedding table (VMEM-resident)
    # out_ref          : (1, TB) lane-dense output tile
    tb = uid_ref.shape[1]
    U = uemb_ref.shape[0]
    I = iemb_ref.shape[0]

    uids = uid_ref[...].reshape(tb, 1)          # (TB, 1) int32
    iids = iid_ref[...].reshape(tb, 1)          # (TB, 1) int32

    # One-hot gather on the MXU (exact: 1.0 * x + 0.0 * ...), f32 accumulation.
    onehot_u = (uids == jax.lax.broadcasted_iota(jnp.int32, (tb, U), 1)
                ).astype(jnp.float32)           # (TB, U)
    onehot_i = (iids == jax.lax.broadcasted_iota(jnp.int32, (tb, I), 1)
                ).astype(jnp.float32)           # (TB, I)

    u_rows = jnp.dot(onehot_u, uemb_ref[...].astype(jnp.float32),
                     preferred_element_type=jnp.float32)   # (TB, F)
    i_rows = jnp.dot(onehot_i, iemb_ref[...].astype(jnp.float32),
                     preferred_element_type=jnp.float32)   # (TB, F)

    # Elementwise product + feature reduction in f32, lane-dense store.
    dots = jnp.sum(u_rows * i_rows, axis=-1)                # (TB,)
    out_ref[...] = dots.reshape(1, tb).astype(out_ref.dtype)


def matrix_factorization_forward(user_ids, item_ids, user_emb, item_emb, *, tb=128):
    """user_ids, item_ids: int [B]; user_emb: [U, F]; item_emb: [I, F] -> [B]."""
    B = user_ids.shape[0]
    U, F = user_emb.shape
    I, _ = item_emb.shape

    nb = pl.cdiv(B, tb)
    b_pad = nb * tb

    # Pad ids to a multiple of TB (index 0 is always valid); reshape to tiles.
    uids = jnp.zeros((b_pad,), jnp.int32).at[:B].set(
        user_ids.astype(jnp.int32)).reshape(nb, tb)
    iids = jnp.zeros((b_pad,), jnp.int32).at[:B].set(
        item_ids.astype(jnp.int32)).reshape(nb, tb)

    grid_spec = pltpu.PrefetchScalarGridSpec(
        num_scalar_prefetch=0,
        grid=(nb,),
        in_specs=[
            pl.BlockSpec((1, tb), lambda b: (b, 0)),   # user ids tile
            pl.BlockSpec((1, tb), lambda b: (b, 0)),   # item ids tile
            pl.BlockSpec((U, F), lambda b: (0, 0)),    # full user table (resident)
            pl.BlockSpec((I, F), lambda b: (0, 0)),    # full item table (resident)
        ],
        out_specs=pl.BlockSpec((1, tb), lambda b: (b, 0)),
    )

    out = pl.pallas_call(
        _mf_kernel,
        out_shape=jax.ShapeDtypeStruct((nb, tb), user_emb.dtype),
        grid_spec=grid_spec,
        compiler_params=pltpu.CompilerParams(
            dimension_semantics=("parallel",),
        ),
    )(uids, iids, user_emb, item_emb)

    return out.reshape(-1)[:B]  # [B], matching .sum(dim=1) of the torch module


if __name__ == "__main__":
    key = jax.random.PRNGKey(0)
    k_u, k_i, k_uid, k_iid = jax.random.split(key, 4)

    num_users, num_items, num_features = 64, 48, 128
    batch = 8

    # Deterministic parameter init (nn.Embedding default: N(0, 1), float32)
    user_emb = jax.random.normal(k_u, (num_users, num_features), dtype=jnp.float32)
    item_emb = jax.random.normal(k_i, (num_items, num_features), dtype=jnp.float32)

    user_ids = jax.random.randint(k_uid, (batch,), 0, num_users, dtype=jnp.int32)
    item_ids = jax.random.randint(k_iid, (batch,), 0, num_items, dtype=jnp.int32)

    out = matrix_factorization_forward(user_ids, item_ids, user_emb, item_emb)
    out = jax.block_until_ready(out)

    # Reference check (plain JAX)
    ref = jnp.sum(user_emb[user_ids] * item_emb[item_ids], axis=1)
    assert out.shape == (batch,)
    assert jnp.allclose(out, ref, atol=1e-4, rtol=1e-4)

    print("KERNEL_OK")
</pallas_src>

<mosaic_0001>
module attributes {stable_mosaic.version = 11 : i64} {
  func.func @_mf_kernel(%arg0: i32, %arg1: memref<1x128xi32, #tpu.memory_space<vmem>>, %arg2: memref<1x128xi32, #tpu.memory_space<vmem>>, %arg3: memref<64x128xf32, #tpu.memory_space<vmem>>, %arg4: memref<48x128xf32, #tpu.memory_space<vmem>>, %arg5: memref<1x128xf32, #tpu.memory_space<vmem>>) attributes {dimension_semantics = [#tpu.dimension_semantics<parallel>], iteration_bounds = array<i64: 1>, scalar_prefetch = 0 : i64, scratch_operands = 0 : i64, tpu.core_type = #tpu.core_type<tc>, window_params = [{transform_indices = @transform_0, window_bounds = array<i64: 1, 128>}, {transform_indices = @transform_1, window_bounds = array<i64: 1, 128>}, {pipeline_mode = #tpu.pipeline_mode<synchronous>, transform_indices = @transform_2, window_bounds = array<i64: 64, 128>}, {pipeline_mode = #tpu.pipeline_mode<synchronous>, transform_indices = @transform_3, window_bounds = array<i64: 48, 128>}, {transform_indices = @transform_4, window_bounds = array<i64: 1, 128>}]} {
    %c0 = arith.constant 0 : index
    %c0_0 = arith.constant 0 : index
    %0 = vector.load %arg1[%c0, %c0_0] : memref<1x128xi32, #tpu.memory_space<vmem>>, vector<1x128xi32>
    %1 = vector.shape_cast %0 : vector<1x128xi32> to vector<128x1xi32>
    %c0_1 = arith.constant 0 : index
    %c0_2 = arith.constant 0 : index
    %2 = vector.load %arg2[%c0_1, %c0_2] : memref<1x128xi32, #tpu.memory_space<vmem>>, vector<1x128xi32>
    %3 = vector.shape_cast %2 : vector<1x128xi32> to vector<128x1xi32>
    %4 = tpu.iota {dimensions = array<i32: 1>} : vector<128x64xi32>
    %5 = vector.broadcast %1 : vector<128x1xi32> to vector<128x64xi32>
    %6 = arith.cmpi eq, %5, %4 : vector<128x64xi32>
    %7 = arith.extui %6 : vector<128x64xi1> to vector<128x64xi32>
    %8 = arith.sitofp %7 : vector<128x64xi32> to vector<128x64xf32>
    %9 = tpu.iota {dimensions = array<i32: 1>} : vector<128x48xi32>
    %10 = vector.broadcast %3 : vector<128x1xi32> to vector<128x48xi32>
    %11 = arith.cmpi eq, %10, %9 : vector<128x48xi32>
    %12 = arith.extui %11 : vector<128x48xi1> to vector<128x48xi32>
    %13 = arith.sitofp %12 : vector<128x48xi32> to vector<128x48xf32>
    %c0_3 = arith.constant 0 : index
    %c0_4 = arith.constant 0 : index
    %14 = vector.load %arg3[%c0_3, %c0_4] : memref<64x128xf32, #tpu.memory_space<vmem>>, vector<64x128xf32>
    %cst = arith.constant dense<0.000000e+00> : vector<128x128xf32>
    %15 = tpu.matmul %8, %14, %cst {dimension_numbers = #tpu.dot_dimension_numbers<[1], [0], [0], [1], [0, 0, 1, 1], [], []>} : vector<128x64xf32>, vector<64x128xf32>, vector<128x128xf32> -> vector<128x128xf32>
    %c0_5 = arith.constant 0 : index
    %c0_6 = arith.constant 0 : index
    %16 = vector.load %arg4[%c0_5, %c0_6] : memref<48x128xf32, #tpu.memory_space<vmem>>, vector<48x128xf32>
    %cst_7 = arith.constant dense<0.000000e+00> : vector<128x128xf32>
    %17 = tpu.matmul %13, %16, %cst_7 {dimension_numbers = #tpu.dot_dimension_numbers<[1], [0], [0], [1], [0, 0, 1, 1], [], []>} : vector<128x48xf32>, vector<48x128xf32>, vector<128x128xf32> -> vector<128x128xf32>
    %18 = arith.mulf %15, %17 : vector<128x128xf32>
    %cst_8 = arith.constant dense<0.000000e+00> : vector<128xf32>
    %19 = vector.multi_reduction <add>, %18, %cst_8 [1] : vector<128x128xf32> to vector<128xf32>
    %20 = vector.shape_cast %19 : vector<128xf32> to vector<1x128xf32>
    %c0_9 = arith.constant 0 : index
    %c0_10 = arith.constant 0 : index
    %21 = vector.load %arg5[%c0_9, %c0_10] : memref<1x128xf32, #tpu.memory_space<vmem>>, vector<1x128xf32>
    tpu.vector_store %arg5[%c0_9, %c0_10], %20 {strides = array<i32>} : memref<1x128xf32, #tpu.memory_space<vmem>>, vector<1x128xf32>,
    return
  }
  func.func @transform_0(%arg0: i32) -> (i32, i32) {
    %c0_i32 = arith.constant 0 : i32
    %c0_i32_0 = arith.constant 0 : i32
    return %arg0, %c0_i32 : i32, i32
  }
  func.func @transform_1(%arg0: i32) -> (i32, i32) {
    %c0_i32 = arith.constant 0 : i32
    %c0_i32_0 = arith.constant 0 : i32
    return %arg0, %c0_i32 : i32, i32
  }
  func.func @transform_2(%arg0: i32) -> (i32, i32) {
    %c0_i32 = arith.constant 0 : i32
    %c0_i32_0 = arith.constant 0 : i32
    %c0_i32_1 = arith.constant 0 : i32
    return %c0_i32, %c0_i32_0 : i32, i32
  }
  func.func @transform_3(%arg0: i32) -> (i32, i32) {
    %c0_i32 = arith.constant 0 : i32
    %c0_i32_0 = arith.constant 0 : i32
    %c0_i32_1 = arith.constant 0 : i32
    return %c0_i32, %c0_i32_0 : i32, i32
  }
  func.func @transform_4(%arg0: i32) -> (i32, i32) {
    %c0_i32 = arith.constant 0 : i32
    %c0_i32_0 = arith.constant 0 : i32
    return %arg0, %c0_i32 : i32, i32
  }
}

</mosaic_0001>

<bundles_post_ra>
// kernel: tpu_custom_call.1
= control target key start
LH: loop header
LB: loop body
LE: loop exit
PB: predicated region body
PF: predicated region fallthrough
CT: control target
= control target key end

     0   :  { %9 = vsyncpa [#allocation3], 0  ;;  %s1442_s0 = inlined_call_operand.hbm [shape: s32[1,128], index: 0, kind: input, shape index: {}]   ;;  %s1443_s1 = inlined_call_operand.vmem [shape: s32[1,128], index: 1, kind: input, shape index: {}]   ;;  %s1444_s2 = inlined_call_operand.hbm [shape: f32[64,128], index: 2, kind: input, shape index: {}]   ;;  %s1445_s3 = inlined_call_operand.hbm [shape: f32[48,128], index: 3, kind: input, shape index: {}]   ;;  %s1446_s4 = inlined_call_operand.hbm [shape: f32[1,128], index: 4, kind: output, shape index: {}]  }
   0x1   :  { %10 = vsyncpa [#allocation6], 0 }
   0x2   :  { %11 = vsyncpa [#allocation4], 0  ;;  %s1201_s15 = smov [#allocation5]   ;;  %s1107_s19 = scalar_lea.hbm %s1444_s2, 1024 }
   0x3   :  { %s29_s16 = sshll.u32 %s1201_s15, 4  ;;  %p1108_p0 = scmp.ne.s32.totalorder %s1444_s2, %s1107_s19  ;;  %s30_s16 = int_to_ptr.vmem [resolvable:$true] %s29_s16 }
   0x4   :  { %p1111_p1 = scmp.lt.u32.totalorder %s1107_s19, %s1444_s2 }
   0x6   :  { %p1113_p2 = pnand %p1111_p1, %p1108_p0 }
   0x8   :  { %1116 = shalt.err (!%p1113_p2)
}
   0x9   :  { %s1117_s24 = scalar_lea.vmem %s30_s16, 1024  ;;  %p1122_p4 = scmp.lt.s32.totalorder %s30_s16, %s30_s16 }
   0xa   :  { %p1118_p3 = scmp.ne.s32.totalorder %s30_s16, %s1117_s24  ;;  %p1123_p5 = scmp.lt.s32.totalorder %s1117_s24, %s1117_s24 }
   0xc   :  { %p1124_p6 = por %p1123_p5, %p1122_p4 }
   0xe   :  { %p1125_p7 = pnand %p1124_p6, %p1118_p3 }
  0x10   :  { %1128 = shalt.err (!%p1125_p7)
}
  0x11   :  { %s1202_s25 = smov 128   ;;  %s1203_s26 = smov 8  }
  0x12   :  { %35 = dma.hbm_to_vmem [thread:$0]  %s1444_s2, 1024, %s30_s16, [#allocation6], %s1202_s25, %s1202_s25, %s1203_s26  }
  0x13   :  { %s1204_s29 = smov [#allocation2]   ;;  %s1205_s5 = smov [#allocation7]  }
  0x14   :  { %s18_s30 = sshll.u32 %s1204_s29, 4  ;;  %s41_s6 = sshll.u32 %s1205_s5, 4  ;;  %s19_s30 = int_to_ptr.vmem [resolvable:$true] %s18_s30  ;;  %s42_s6 = int_to_ptr.vmem [resolvable:$true] %s41_s6 }
  0x15   :  { %s1129_s9 = scalar_lea.hbm %s1442_s0, 16 }
  0x16   :  { %p1130_p8 = scmp.ne.s32.totalorder %s1442_s0, %s1129_s9  ;;  %p1133_p9 = scmp.lt.u32.totalorder %s1129_s9, %s1442_s0 }
  0x18   :  { %p1135_p10 = pnand %p1133_p9, %p1130_p8 }
  0x1a   :  { %1138 = shalt.err (!%p1135_p10)
}
  0x1b   :  { %s1139_s2 = scalar_lea.vmem %s19_s30, 16  ;;  %s1143_s14 = scalar_lea.vmem %s19_s30, 32 }
  0x1c   :  { %p1140_p11 = scmp.ne.s32.totalorder %s19_s30, %s1139_s2  ;;  %p1144_p12 = scmp.lt.s32.totalorder %s19_s30, %s19_s30 }
  0x1d   :  { %p1145_p13 = scmp.lt.s32.totalorder %s1143_s14, %s1139_s2 }
  0x1f   :  { %p1146_p0 = por %p1145_p13, %p1144_p12 }
  0x21   :  { %p1147_p1 = pnand %p1146_p0, %p1140_p11 }
  0x23   :  { %1150 = shalt.err (!%p1147_p1)
}
  0x24   :  { %21 = dma.hbm_to_vmem [thread:$0]  %s1442_s0, 16, %s19_s30, [#allocation3]  }
  0x25   :  { %s1151_s19 = scalar_lea.hbm %s1445_s3, 768 }
  0x26   :  { %p1152_p2 = scmp.ne.s32.totalorder %s1445_s3, %s1151_s19  ;;  %p1155_p3 = scmp.lt.u32.totalorder %s1151_s19, %s1445_s3 }
  0x28   :  { %p1157_p4 = pnand %p1155_p3, %p1152_p2 }
  0x2a   :  { %1160 = shalt.err (!%p1157_p4)
}
  0x2b   :  { %s1161_s24 = scalar_lea.vmem %s42_s6, 768  ;;  %p1166_p6 = scmp.lt.s32.totalorder %s42_s6, %s42_s6 }
  0x2c   :  { %p1162_p5 = scmp.ne.s32.totalorder %s42_s6, %s1161_s24  ;;  %p1167_p7 = scmp.lt.s32.totalorder %s1161_s24, %s1161_s24 }
  0x2e   :  { %p1168_p8 = por %p1167_p7, %p1166_p6 }
  0x30   :  { %p1169_p9 = pnand %p1168_p8, %p1162_p5 }
  0x32   :  { %1172 = shalt.err (!%p1169_p9)
}
  0x33   :  { %47 = dma.hbm_to_vmem [thread:$0]  %s1445_s3, 768, %s42_s6, [#allocation6], %s1202_s25, %s1202_s25, %s1203_s26  }
  0x34   :  { %1195 = dma.done.wait [#allocation3], 16  }
  0x35   :  { %1196 = vsyncadd [#allocation3], 4294967280 }
  0x36   :  { %1197 = dma.done.wait [#allocation6], 1792  }
  0x37   :  { %1198 = vsyncadd [#allocation6], 4294965504  ;;  %v1275_v0 = vld [vmem:[#allocation2] ss:$0 sm:$0xff]  ;;  %v291_v1 = vld [vmem:[#allocation5] sm:$0xff]  ;;  %v193_v23 = vlaneseq  ;;  %vm299_vm0 = vcmask 523264  }
  0x38   :  { %67 = vbcast.lane.b32.xlu1 %v1275_v0, 264  ;;  %63 = vbcast.lane.b32.xlu0 %v1275_v0, 256  ;;  %v292_v2 = vld [vmem:[#allocation5 + $0x8] sm:$0xff]  ;;  %v293_v3 = vld [vmem:[#allocation5 + $0x10] sm:$0xff]  ;;  %v294_v4 = vld [vmem:[#allocation5 + $0x18] sm:$0xff]  ;;  %v1206_v27 = vmov 0.0  }
  0x39   :  { %v885_v5 = vld [vmem:[%s1443_s1] ss:$0 sm:$0xff]  ;;  %v1072_v6 = vpack.c.bf16 %v292_v2, %v291_v1  ;;  %v493_v7 = vld [vmem:[#allocation7] sm:$0xff]  ;;  %v1076_v8 = vpack.c.bf16 %v294_v4, %v293_v3  ;;  %v494_v10 = vld [vmem:[#allocation7 + $0x8] sm:$0xff]  ;;  %v1297_v24 = vand.u32 127, %v193_v23  ;;  %vm499_vm3 = vcmask 392192  }
  0x3a   :  { %v295_v9 = vld [vmem:[#allocation5 + $0x20] sm:$0xff]  ;;  %v296_v11 = vld [vmem:[#allocation5 + $0x28] sm:$0xff]  ;;  %v1088_v12 = vpack.c.bf16 %v494_v10, %v493_v7  ;;  %v495_v13 = vld [vmem:[#allocation7 + $0x10] sm:$0xff]  ;;  %s1207_s1 = smov [#allocation8]  }
  0x3b   :  { %1073 = vmatprep.subr.bf16.mxu0 %v1072_v6  ;;  %v496_v14 = vld [vmem:[#allocation7 + $0x18] sm:$0xff]  ;;  %v497_v16 = vld [vmem:[#allocation7 + $0x20] sm:$0xff]  ;;  %v498_v17 = vld [vmem:[#allocation7 + $0x28] sm:$0xff]  ;;  %v1080_v18 = vpack.c.bf16 %v296_v11, %v295_v9  ;;  %s874_s3 = sshll.u32 %s1207_s1, 4  ;;  %s875_s3 = int_to_ptr.vmem [resolvable:$true] %s874_s3 }
  0x3c   :  { %135 = vbcast.lane.b32.xlu1 %v885_v5, 264  ;;  %131 = vbcast.lane.b32.xlu0 %v885_v5, 256  ;;  %v1092_v15 = vpack.c.bf16 %v496_v14, %v495_v13  ;;  %v297_v19 = vld [vmem:[#allocation5 + $0x30] sm:$0xff]  ;;  %v298_v20 = vld [vmem:[#allocation5 + $0x38] sm:$0xff]  ;;  %v1096_v21 = vpack.c.bf16 %v498_v17, %v497_v16  ;;  %s1173_s25 = scalar_lea.vmem %s875_s3, 16  ;;  %s1177_s26 = scalar_lea.vmem %s875_s3, 32 }
  0x3d   :  { %1075 = vmatpush3.bf16.msra.mxu0 %v1072_v6  ;;  %1089 = vmatprep.subr.bf16.mxu1 %v1088_v12  ;;  %v1084_v22 = vpack.c.bf16 %v298_v20, %v297_v19  ;;  %p1174_p10 = scmp.ne.s32.totalorder %s875_s3, %s1173_s25  ;;  %p1178_p11 = scmp.lt.s32.totalorder %s875_s3, %s875_s3 }
  0x3e   :  { %1077 = vmatprep.subr.bf16.mxu0 %v1076_v8  ;;  %1091 = vmatpush3.bf16.msra.mxu1 %v1088_v12  ;;  %p1179_p12 = scmp.lt.s32.totalorder %s1177_s26, %s1173_s25 }
  0x3f   :  { %1093 = vmatprep.subr.bf16.mxu1 %v1092_v15 }
  0x40   :  { %139 = vbcast.lane.b32.xlu1 %v885_v5, 272  ;;  %71 = vbcast.lane.b32.xlu0 %v1275_v0, 272  ;;  %p1180_p13 = por %p1179_p12, %p1178_p11 }
  0x41   :  { %1079 = vmatpush3.bf16.msra.mxu0 %v1076_v8 }
  0x42   :  { %1081 = vmatprep.subr.bf16.mxu0 %v1080_v18  ;;  %1095 = vmatpush3.bf16.msra.mxu1 %v1092_v15  ;;  %p1181_p0 = pnand %p1180_p13, %p1174_p10 }
  0x43   :  { %1097 = vmatprep.subr.bf16.mxu1 %v1096_v21 }
  0x44   :  { %143 = vbcast.lane.b32.xlu1 %v885_v5, 280  ;;  %75 = vbcast.lane.b32.xlu0 %v1275_v0, 280 }
  0x45   :  { %1083 = vmatpush3.bf16.msra.mxu0 %v1080_v18 }
  0x46   :  { %1085 = vmatprep.subr.bf16.mxu0 %v1084_v22  ;;  %1099 = vmatpush3.bf16.msra.mxu1 %v1096_v21 }
  0x48   :  { %147 = vbcast.lane.b32.xlu1 %v885_v5, 288  ;;  %79 = vbcast.lane.b32.xlu0 %v1275_v0, 288 }
  0x49   :  { %1087 = vmatpush3.bf16.msra.mxu0 %v1084_v22 }
  0x4c   :  { %151 = vbcast.lane.b32.xlu1 %v885_v5, 296  ;;  %83 = vbcast.lane.b32.xlu0 %v1275_v0, 296 }
  0x50   :  { %155 = vbcast.lane.b32.xlu1 %v885_v5, 304  ;;  %87 = vbcast.lane.b32.xlu0 %v1275_v0, 304 }
  0x54   :  { %159 = vbcast.lane.b32.xlu1 %v885_v5, 312  ;;  %91 = vbcast.lane.b32.xlu0 %v1275_v0, 312 }
  0x58   :  { %163 = vbcast.lane.b32.xlu1 %v885_v5, 320  ;;  %95 = vbcast.lane.b32.xlu0 %v1275_v0, 320 }
  0x5c   :  { %167 = vbcast.lane.b32.xlu1 %v885_v5, 328  ;;  %99 = vbcast.lane.b32.xlu0 %v1275_v0, 328 }
  0x60   :  { %171 = vbcast.lane.b32.xlu1 %v885_v5, 336  ;;  %103 = vbcast.lane.b32.xlu0 %v1275_v0, 336 }
  0x64   :  { %175 = vbcast.lane.b32.xlu1 %v885_v5, 344  ;;  %107 = vbcast.lane.b32.xlu0 %v1275_v0, 344 }
  0x68   :  { %179 = vbcast.lane.b32.xlu1 %v885_v5, 352  ;;  %111 = vbcast.lane.b32.xlu0 %v1275_v0, 352 }
  0x6c   :  { %183 = vbcast.lane.b32.xlu1 %v885_v5, 360  ;;  %115 = vbcast.lane.b32.xlu0 %v1275_v0, 360 }
  0x70   :  { %187 = vbcast.lane.b32.xlu1 %v885_v5, 368  ;;  %119 = vbcast.lane.b32.xlu0 %v1275_v0, 368 }
  0x74   :  { %191 = vbcast.lane.b32.xlu1 %v885_v5, 376  ;;  %123 = vbcast.lane.b32.xlu0 %v1275_v0, 376 }
  0xaa   :  { %v68_v25 = vpop.permute.xlu1 %67  ;;  %v64_v26 = vpop.permute.xlu0 %63 }
  0xab   :  { %vm196_vm1 = vcmp.eq.s32.totalorder %v68_v25, %v1297_v24  ;;  %vm195_vm2 = vcmp.eq.s32.totalorder %v64_v26, %v1297_v24 }
  0xac   :  { %v887_v28 = vsel %vm196_vm1, 1.0, %v1206_v27  ;;  %v886_v29 = vsel %vm195_vm2, 1.0, %v1206_v27 }
  0xad   :  { %1012 = vmatprep.mubr.msk.f32.mxu0 %vm299_vm0, %v886_v29 }
  0xae   :  { %v136_v30 = vpop.permute.xlu1 %135  ;;  %1013 = vmatmul.mubr.msk.f32.vlgmr.msra.gmra.mrb[0].mxu0 %vm299_vm0, %v887_v28  ;;  %v132_v31 = vpop.permute.xlu0 %131 }
  0xaf   :  { %vm244_vm4 = vcmp.eq.s32.totalorder %v136_v30, %v1297_v24  ;;  %vm243_vm5 = vcmp.eq.s32.totalorder %v132_v31, %v1297_v24 }
  0xb0   :  { %v903_v32 = vsel %vm244_vm4, 1.0, %v1206_v27  ;;  %v902_v33 = vsel %vm243_vm5, 1.0, %v1206_v27 }
  0xb1   :  { %1048 = vmatprep.mubr.msk.f32.mxu1 %vm499_vm3, %v902_v33 }
  0xb2   :  { %v140_v34 = vpop.permute.xlu1 %139  ;;  %1049 = vmatmul.mubr.msk.f32.vlgmr.msra.gmra.mrb[0].mxu1 %vm499_vm3, %v903_v32  ;;  %v72_v35 = vpop.permute.xlu0 %71 }
  0xb3   :  { %vm245_vm6 = vcmp.eq.s32.totalorder %v140_v34, %v1297_v24  ;;  %vm197_vm7 = vcmp.eq.s32.totalorder %v72_v35, %v1297_v24 }
  0xb4   :  { %v904_v36 = vsel %vm245_vm6, 1.0, %v1206_v27  ;;  %v888_v37 = vsel %vm197_vm7, 1.0, %v1206_v27 }
  0xb5   :  { %1015 = vmatprep.mubr.msk.f32.mxu0 %vm299_vm0, %v888_v37  ;;  %1051 = vmatprep.mubr.msk.f32.mxu1 %vm499_vm3, %v904_v36 }
  0xb6   :  { %v144_v38 = vpop.permute.xlu1 %143  ;;  %v76_v39 = vpop.permute.xlu0 %75 }
  0xb7   :  { %vm246_vm8 = vcmp.eq.s32.totalorder %v144_v38, %v1297_v24  ;;  %vm198_vm9 = vcmp.eq.s32.totalorder %v76_v39, %v1297_v24 }
  0xb8   :  { %v905_v40 = vsel %vm246_vm8, 1.0, %v1206_v27  ;;  %v889_v41 = vsel %vm198_vm9, 1.0, %v1206_v27 }
  0xb9   :  { %1016 = vmatmul.mubr.msk.f32.gmra.mrb[2].mxu0 %vm299_vm0, %v889_v41  ;;  %1052 = vmatmul.mubr.msk.f32.gmra.mrb[2].mxu1 %vm499_vm3, %v905_v40 }
  0xba   :  { %v148_v42 = vpop.permute.xlu1 %147  ;;  %v80_v43 = vpop.permute.xlu0 %79 }
  0xbb   :  { %vm247_vm10 = vcmp.eq.s32.totalorder %v148_v42, %v1297_v24  ;;  %vm199_vm11 = vcmp.eq.s32.totalorder %v80_v43, %v1297_v24 }
  0xbc   :  { %v906_v44 = vsel %vm247_vm10, 1.0, %v1206_v27  ;;  %v890_v45 = vsel %vm199_vm11, 1.0, %v1206_v27 }
  0xbd   :  { %1018 = vmatprep.mubr.msk.f32.mxu0 %vm299_vm0, %v890_v45  ;;  %1054 = vmatprep.mubr.msk.f32.mxu1 %vm499_vm3, %v906_v44 }
  0xbe   :  { %v152_v46 = vpop.permute.xlu1 %151  ;;  %v84_v47 = vpop.permute.xlu0 %83 }
  0xbf   :  { %vm248_vm12 = vcmp.eq.s32.totalorder %v152_v46, %v1297_v24  ;;  %vm200_vm13 = vcmp.eq.s32.totalorder %v84_v47, %v1297_v24 }
  0xc0   :  { %v907_v48 = vsel %vm248_vm12, 1.0, %v1206_v27  ;;  %v891_v49 = vsel %vm200_vm13, 1.0, %v1206_v27 }
  0xc1   :  { %1019 = vmatmul.mubr.msk.f32.gmra.mrb[4].mxu0 %vm299_vm0, %v891_v49  ;;  %1055 = vmatmul.mubr.msk.f32.gmra.mrb[4].mxu1 %vm499_vm3, %v907_v48 }
  0xc2   :  { %v156_v50 = vpop.permute.xlu1 %155  ;;  %v88_v51 = vpop.permute.xlu0 %87 }
  0xc3   :  { %vm249_vm14 = vcmp.eq.s32.totalorder %v156_v50, %v1297_v24  ;;  %vm201_vm15 = vcmp.eq.s32.totalorder %v88_v51, %v1297_v24 }
  0xc4   :  { %v908_v52 = vsel %vm249_vm14, 1.0, %v1206_v27  ;;  %v892_v53 = vsel %vm201_vm15, 1.0, %v1206_v27 }
  0xc5   :  { %1021 = vmatprep.mubr.msk.f32.mxu0 %vm299_vm0, %v892_v53  ;;  %1057 = vmatprep.mubr.msk.f32.mxu1 %vm499_vm3, %v908_v52 }
  0xc6   :  { %v160_v54 = vpop.permute.xlu1 %159  ;;  %v92_v55 = vpop.permute.xlu0 %91 }
  0xc7   :  { %vm250_vm1 = vcmp.eq.s32.totalorder %v160_v54, %v1297_v24  ;;  %vm202_vm2 = vcmp.eq.s32.totalorder %v92_v55, %v1297_v24 }
  0xc8   :  { %v909_v56 = vsel %vm250_vm1, 1.0, %v1206_v27  ;;  %v893_v57 = vsel %vm202_vm2, 1.0, %v1206_v27 }
  0xc9   :  { %1022 = vmatmul.mubr.msk.f32.gmra.mrb[6].mxu0 %vm299_vm0, %v893_v57  ;;  %1058 = vmatmul.mubr.msk.f32.gmra.mrb[6].mxu1 %vm499_vm3, %v909_v56 }
  0xca   :  { %v164_v58 = vpop.permute.xlu1 %163  ;;  %v96_v59 = vpop.permute.xlu0 %95 }
  0xcb   :  { %vm251_vm4 = vcmp.eq.s32.totalorder %v164_v58, %v1297_v24  ;;  %vm203_vm5 = vcmp.eq.s32.totalorder %v96_v59, %v1297_v24 }
  0xcc   :  { %v910_v60 = vsel %vm251_vm4, 1.0, %v1206_v27  ;;  %v894_v61 = vsel %vm203_vm5, 1.0, %v1206_v27 }
  0xcd   :  { %1024 = vmatprep.mubr.msk.f32.mxu0 %vm299_vm0, %v894_v61  ;;  %1060 = vmatprep.mubr.msk.f32.mxu1 %vm499_vm3, %v910_v60 }
  0xce   :  { %v168_v62 = vpop.permute.xlu1 %167  ;;  %v100_v63 = vpop.permute.xlu0 %99 }
  0xcf   :  { %vm252_vm6 = vcmp.eq.s32.totalorder %v168_v62, %v1297_v24  ;;  %vm204_vm7 = vcmp.eq.s32.totalorder %v100_v63, %v1297_v24 }
  0xd0   :  { %v911_v0 = vsel %vm252_vm6, 1.0, %v1206_v27  ;;  %v895_v1 = vsel %vm204_vm7, 1.0, %v1206_v27  ;;  %vm780_vm6 = vcmask 261312   ;;  %vm787_vm7 = vcmask 326912  }
  0xd1   :  { %1025 = vmatmul.mubr.msk.f32.gmra.mrb[8].mxu0 %vm299_vm0, %v895_v1  ;;  %1061 = vmatmul.mubr.msk.f32.gmra.mrb[8].mxu1 %vm499_vm3, %v911_v0 }
  0xd2   :  { %v172_v2 = vpop.permute.xlu1 %171  ;;  %v104_v3 = vpop.permute.xlu0 %103 }
  0xd3   :  { %vm253_vm8 = vcmp.eq.s32.totalorder %v172_v2, %v1297_v24  ;;  %vm205_vm9 = vcmp.eq.s32.totalorder %v104_v3, %v1297_v24 }
  0xd4   :  { %v912_v4 = vsel %vm253_vm8, 1.0, %v1206_v27  ;;  %v896_v5 = vsel %vm205_vm9, 1.0, %v1206_v27  ;;  %vm794_vm8 = vcmask 392512   ;;  %vm801_vm9 = vcmask 458112  }
  0xd5   :  { %1027 = vmatprep.mubr.msk.f32.mxu0 %vm299_vm0, %v896_v5  ;;  %1063 = vmatprep.mubr.msk.f32.mxu1 %vm499_vm3, %v912_v4 }
  0xd6   :  { %v176_v6 = vpop.permute.xlu1 %175  ;;  %v108_v7 = vpop.permute.xlu0 %107 }
  0xd7   :  { %vm254_vm10 = vcmp.eq.s32.totalorder %v176_v6, %v1297_v24  ;;  %vm206_vm11 = vcmp.eq.s32.totalorder %v108_v7, %v1297_v24 }
  0xd8   :  { %v913_v8 = vsel %vm254_vm10, 1.0, %v1206_v27  ;;  %v897_v9 = vsel %vm206_vm11, 1.0, %v1206_v27  ;;  %vm808_vm10 = vcmask 523712   ;;  %vm815_vm11 = vcmask 589312  }
  0xd9   :  { %1028 = vmatmul.mubr.msk.f32.gmra.mrb[10].mxu0 %vm299_vm0, %v897_v9  ;;  %1064 = vmatmul.mubr.msk.f32.gmra.mrb[10].mxu1 %vm499_vm3, %v913_v8 }
  0xda   :  { %v180_v10 = vpop.permute.xlu1 %179  ;;  %v112_v11 = vpop.permute.xlu0 %111 }
  0xdb   :  { %vm255_vm12 = vcmp.eq.s32.totalorder %v180_v10, %v1297_v24  ;;  %vm207_vm13 = vcmp.eq.s32.totalorder %v112_v11, %v1297_v24 }
  0xdc   :  { %v914_v12 = vsel %vm255_vm12, 1.0, %v1206_v27  ;;  %v898_v13 = vsel %vm207_vm13, 1.0, %v1206_v27  ;;  %vm822_vm12 = vcmask 654912   ;;  %vm829_vm13 = vcmask 720512  }
  0xdd   :  { %1030 = vmatprep.mubr.msk.f32.mxu0 %vm299_vm0, %v898_v13  ;;  %1066 = vmatprep.mubr.msk.f32.mxu1 %vm499_vm3, %v914_v12  ;;  %v1396_v13 = vshrl.u32 %v193_v23, 7 }
  0xde   :  { %v184_v14 = vpop.permute.xlu1 %183  ;;  %v116_v15 = vpop.permute.xlu0 %115 }
  0xdf   :  { %vm256_vm14 = vcmp.eq.s32.totalorder %v184_v14, %v1297_v24  ;;  %vm208_vm15 = vcmp.eq.s32.totalorder %v116_v15, %v1297_v24  ;;  %v761_v14 = vadd.s32 4294967288, %v1297_v24 }
  0xe0   :  { %v915_v16 = vsel %vm256_vm14, 1.0, %v1206_v27  ;;  %v899_v17 = vsel %vm208_vm15, 1.0, %v1206_v27  ;;  %vm836_vm14 = vcmask 786112   ;;  %vm843_vm15 = vcmask 851712  }
  0xe1   :  { %1031 = vmatmul.mubr.msk.f32.gmra.mrb[12].mxu0 %vm299_vm0, %v899_v17  ;;  %1067 = vmatmul.mubr.msk.f32.gmra.mrb[12].mxu1 %vm499_vm3, %v915_v16  ;;  %v768_v16 = vadd.s32 4294967280, %v1297_v24  ;;  %v764_v17 = vsub.s32 %v761_v14, %v1396_v13 }
  0xe2   :  { %v188_v18 = vpop.permute.xlu1 %187  ;;  %v120_v19 = vpop.permute.xlu0 %119 }
  0xe3   :  { %vm257_vm1 = vcmp.eq.s32.totalorder %v188_v18, %v1297_v24  ;;  %vm209_vm2 = vcmp.eq.s32.totalorder %v120_v19, %v1297_v24  ;;  %v759_v18 = vsub.s32 %v1297_v24, %v1396_v13 }
  0xe4   :  { %v916_v20 = vsel %vm257_vm1, 1.0, %v1206_v27  ;;  %v900_v21 = vsel %vm209_vm2, 1.0, %v1206_v27  ;;  %vm850_vm1 = vcmask 917312   ;;  %vm857_vm2 = vcmask 982912  }
  0xe5   :  { %1033 = vmatprep.mubr.msk.f32.mxu0 %vm299_vm0, %v900_v21  ;;  %1069 = vmatprep.mubr.msk.f32.mxu1 %vm499_vm3, %v916_v20  ;;  %v771_v20 = vsub.s32 %v768_v16, %v1396_v13  ;;  %v782_v21 = vadd.s32 4294967264, %v1297_v24 }
  0xe6   :  { %v192_v22 = vpop.permute.xlu1 %191  ;;  %v124_v25 = vpop.permute.xlu0 %123 }
  0xe7   :  { %vm258_vm4 = vcmp.eq.s32.totalorder %v192_v22, %v1297_v24  ;;  %vm210_vm5 = vcmp.eq.s32.totalorder %v124_v25, %v1297_v24  ;;  %v775_v22 = vadd.s32 4294967272, %v1297_v24 }
  0xe8   :  { %v917_v26 = vsel %vm258_vm4, 1.0, %v1206_v27  ;;  %v901_v28 = vsel %vm210_vm5, 1.0, %v1206_v27  ;;  %vm864_vm4 = vcmask 1048512  }
  0xe9   :  { %1034 = vmatmul.mubr.msk.f32.gmra.mrb[14].mxu0 %vm299_vm0, %v901_v28  ;;  %1070 = vmatmul.mubr.msk.f32.gmra.mrb[14].mxu1 %vm499_vm3, %v917_v26  ;;  %vm766_vm0 = vcmask 130112   ;;  %vm773_vm3 = vcmask 195712  }
 0x181   :  { %v1014_v29 = vpop.f32.mrb[0].mxu0 }
 0x182   :  { %v414_v30 = vpop.f32.mrb[1].mxu0 }
 0x185   :  { %v1050_v31 = vpop.f32.mrb[0].mxu1 }
 0x186   :  { %v694_v32 = vmul.f32 %v1050_v31, %v1014_v29  ;;  %v614_v33 = vpop.f32.mrb[1].mxu1  ;;  %v785_v29 = vsub.s32 %v782_v21, %v1396_v13  ;;  %v778_v31 = vsub.s32 %v775_v22, %v1396_v13 }
 0x187   :  { %v693_v34 = vmul.f32 %v614_v33, %v414_v30  ;;  %v796_v30 = vadd.s32 4294967248, %v1297_v24 }
 0x188   :  { %711 = vadd.xlane.f32.xlu1 %v694_v32  ;;  %v789_v32 = vadd.s32 4294967256, %v1297_v24 }
 0x189   :  { %709 = vadd.xlane.f32.xlu0 %v693_v34 }
 0x18c   :  { %v1017_v35 = vpop.f32.mrb[2].mxu0  ;;  %v1053_v36 = vpop.f32.mrb[2].mxu1 }
 0x18d   :  { %v696_v37 = vmul.f32 %v1053_v36, %v1017_v35  ;;  %v424_v38 = vpop.f32.mrb[3].mxu0  ;;  %v624_v39 = vpop.f32.mrb[3].mxu1 }
 0x18e   :  { %v695_v40 = vmul.f32 %v624_v39, %v424_v38  ;;  %v799_v38 = vsub.s32 %v796_v30, %v1396_v13  ;;  %v810_v39 = vadd.s32 4294967232, %v1297_v24 }
 0x18f   :  { %715 = vadd.xlane.f32.xlu0 %v696_v37 }
 0x193   :  { %713 = vadd.xlane.f32.xlu0 %v695_v40 }
 0x194   :  { %v1020_v27 = vpop.f32.mrb[4].mxu0  ;;  %v1056_v41 = vpop.f32.mrb[4].mxu1 }
 0x195   :  { %v698_v42 = vmul.f32 %v1056_v41, %v1020_v27  ;;  %v434_v43 = vpop.f32.mrb[5].mxu0  ;;  %v634_v44 = vpop.f32.mrb[5].mxu1  ;;  %v792_v27 = vsub.s32 %v789_v32, %v1396_v13  ;;  %v803_v41 = vadd.s32 4294967240, %v1297_v24 }
 0x196   :  { %v697_v45 = vmul.f32 %v634_v44, %v434_v43 }
 0x197   :  { %719 = vadd.xlane.f32.xlu0 %v698_v42 }
 0x198   :  { %717 = vadd.xlane.f32.xlu1 %v697_v45 }
 0x19c   :  { %v1023_v46 = vpop.f32.mrb[6].mxu0  ;;  %v1059_v47 = vpop.f32.mrb[6].mxu1 }
 0x19d   :  { %v700_v48 = vmul.f32 %v1059_v47, %v1023_v46  ;;  %v444_v49 = vpop.f32.mrb[7].mxu0  ;;  %v644_v50 = vpop.f32.mrb[7].mxu1  ;;  %v813_v47 = vsub.s32 %v810_v39, %v1396_v13 }
 0x19e   :  { %v699_v51 = vmul.f32 %v644_v50, %v444_v49  ;;  %v806_v50 = vsub.s32 %v803_v41, %v1396_v13 }
 0x19f   :  { %723 = vadd.xlane.f32.xlu0 %v700_v48  ;;  %v824_v48 = vadd.s32 4294967216, %v1297_v24 }
 0x1a0   :  { %721 = vadd.xlane.f32.xlu1 %v699_v51  ;;  %v817_v51 = vadd.s32 4294967224, %v1297_v24 }
 0x1a4   :  { %v1026_v52 = vpop.f32.mrb[8].mxu0  ;;  %v1062_v53 = vpop.f32.mrb[8].mxu1 }
 0x1a5   :  { %v702_v54 = vmul.f32 %v1062_v53, %v1026_v52  ;;  %v454_v55 = vpop.f32.mrb[9].mxu0  ;;  %v654_v56 = vpop.f32.mrb[9].mxu1 }
 0x1a6   :  { %v701_v57 = vmul.f32 %v654_v56, %v454_v55 }
 0x1a7   :  { %727 = vadd.xlane.f32.xlu0 %v702_v54 }
 0x1a8   :  { %725 = vadd.xlane.f32.xlu1 %v701_v57  ;;  %v827_v57 = vsub.s32 %v824_v48, %v1396_v13 }
 0x1ac   :  { %v1029_v58 = vpop.f32.mrb[10].mxu0  ;;  %v1065_v59 = vpop.f32.mrb[10].mxu1 }
 0x1ad   :  { %v704_v60 = vmul.f32 %v1065_v59, %v1029_v58  ;;  %v464_v61 = vpop.f32.mrb[11].mxu0  ;;  %v664_v62 = vpop.f32.mrb[11].mxu1  ;;  %v838_v58 = vadd.s32 4294967200, %v1297_v24 }
 0x1ae   :  { %v703_v63 = vmul.f32 %v664_v62, %v464_v61  ;;  %v831_v61 = vadd.s32 4294967208, %v1297_v24 }
 0x1af   :  { %731 = vadd.xlane.f32.xlu0 %v704_v60  ;;  %v820_v60 = vsub.s32 %v817_v51, %v1396_v13 }
 0x1b0   :  { %729 = vadd.xlane.f32.xlu1 %v703_v63 }
 0x1b4   :  { %v1032_v0 = vpop.f32.mrb[12].mxu0  ;;  %v1068_v1 = vpop.f32.mrb[12].mxu1 }
 0x1b5   :  { %v706_v2 = vmul.f32 %v1068_v1, %v1032_v0  ;;  %v474_v3 = vpop.f32.mrb[13].mxu0  ;;  %v674_v4 = vpop.f32.mrb[13].mxu1 }
 0x1b6   :  { %v705_v5 = vmul.f32 %v674_v4, %v474_v3  ;;  %v841_v3 = vsub.s32 %v838_v58, %v1396_v13 }
 0x1b7   :  { %735 = vadd.xlane.f32.xlu0 %v706_v2 }
 0x1b8   :  { %733 = vadd.xlane.f32.xlu1 %v705_v5  ;;  %v834_v5 = vsub.s32 %v831_v61, %v1396_v13 }
 0x1bc   :  { %v1035_v6 = vpop.f32.mrb[14].mxu0  ;;  %v1071_v7 = vpop.f32.mrb[14].mxu1 }
 0x1bd   :  { %v708_v8 = vmul.f32 %v1071_v7, %v1035_v6  ;;  %v484_v9 = vpop.f32.mrb[15].mxu0  ;;  %v684_v10 = vpop.f32.mrb[15].mxu1  ;;  %v845_v6 = vadd.s32 4294967192, %v1297_v24 }
 0x1be   :  { %v707_v11 = vmul.f32 %v684_v10, %v484_v9  ;;  %v859_v10 = vadd.s32 4294967176, %v1297_v24 }
 0x1bf   :  { %739 = vadd.xlane.f32.xlu0 %v708_v8  ;;  %v852_v8 = vadd.s32 4294967184, %v1297_v24  ;;  %v848_v16 = vsub.s32 %v845_v6, %v1396_v13 }
 0x1c0   :  { %737 = vadd.xlane.f32.xlu1 %v707_v11 }
 0x215   :  { %v712_v19 = vpop.xlane.xlu1 %711 }
 0x216   :  { %v710_v12 = vpop.xlane.xlu0 %709  ;;  %v765_v23 = vrot.slane %v712_v19, %v764_v17  ;;  %v855_v17 = vsub.s32 %v852_v8, %v1396_v13  ;;  %v862_v19 = vsub.s32 %v859_v10, %v1396_v13 }
 0x217   :  { %v760_v26 = vrot.slane %v710_v12, %v759_v18 }
 0x219   :  { %v767_v34 = vsel %vm766_vm0, %v765_v23, %v760_v26 }
 0x21c   :  { %v716_v15 = vpop.xlane.xlu0 %715 }
 0x21d   :  { %v779_v40 = vrot.slane %v716_v15, %v778_v31 }
 0x220   :  { %v714_v25 = vpop.xlane.xlu0 %713 }
 0x221   :  { %v772_v28 = vrot.slane %v714_v25, %v771_v20 }
 0x223   :  { %v774_v35 = vsel %vm773_vm3, %v772_v28, %v767_v34 }
 0x224   :  { %v720_v36 = vpop.xlane.xlu0 %719  ;;  %v781_v43 = vsel %vm780_vm6, %v779_v40, %v774_v35 }
 0x225   :  { %v718_v33 = vpop.xlane.xlu1 %717  ;;  %v793_v49 = vrot.slane %v720_v36, %v792_v27 }
 0x226   :  { %v786_v37 = vrot.slane %v718_v33, %v785_v29 }
 0x228   :  { %v788_v44 = vsel %vm787_vm7, %v786_v37, %v781_v43 }
 0x229   :  { %v795_v53 = vsel %vm794_vm8, %v793_v49, %v788_v44 }
 0x22c   :  { %v724_v45 = vpop.xlane.xlu0 %723 }
 0x22d   :  { %v722_v42 = vpop.xlane.xlu1 %721  ;;  %v807_v59 = vrot.slane %v724_v45, %v806_v50 }
 0x22e   :  { %v800_v46 = vrot.slane %v722_v42, %v799_v38 }
 0x230   :  { %v802_v54 = vsel %vm801_vm9, %v800_v46, %v795_v53 }
 0x231   :  { %v809_v63 = vsel %vm808_vm10, %v807_v59, %v802_v54 }
 0x234   :  { %v728_v55 = vpop.xlane.xlu0 %727 }
 0x235   :  { %v726_v52 = vpop.xlane.xlu1 %725  ;;  %v821_v4 = vrot.slane %v728_v55, %v820_v60 }
 0x236   :  { %v814_v56 = vrot.slane %v726_v52, %v813_v47 }
 0x238   :  { %v816_v0 = vsel %vm815_vm11, %v814_v56, %v809_v63 }
 0x239   :  { %v823_v9 = vsel %vm822_vm12, %v821_v4, %v816_v0 }
 0x23c   :  { %v732_v1 = vpop.xlane.xlu0 %731 }
 0x23d   :  { %v730_v62 = vpop.xlane.xlu1 %729  ;;  %v835_v15 = vrot.slane %v732_v1, %v834_v5 }
 0x23e   :  { %v828_v2 = vrot.slane %v730_v62, %v827_v57 }
 0x240   :  { %v830_v11 = vsel %vm829_vm13, %v828_v2, %v823_v9 }
 0x241   :  { %v837_v18 = vsel %vm836_vm14, %v835_v15, %v830_v11 }
 0x244   :  { %v736_v12 = vpop.xlane.xlu0 %735 }
 0x245   :  { %v734_v7 = vpop.xlane.xlu1 %733  ;;  %v849_v22 = vrot.slane %v736_v12, %v848_v16 }
 0x246   :  { %v842_v14 = vrot.slane %v734_v7, %v841_v3 }
 0x248   :  { %v844_v20 = vsel %vm843_vm15, %v842_v14, %v837_v18 }
 0x249   :  { %v851_v26 = vsel %vm850_vm1, %v849_v22, %v844_v20 }
 0x24c   :  { %v740_v21 = vpop.xlane.xlu0 %739 }
 0x24d   :  { %v738_v25 = vpop.xlane.xlu1 %737  ;;  %v863_v23 = vrot.slane %v740_v21, %v862_v19 }
 0x24e   :  { %v856_v24 = vrot.slane %v738_v25, %v855_v17 }
 0x250   :  { %v858_v28 = vsel %vm857_vm2, %v856_v24, %v851_v26 }
 0x251   :  { %v865_v29 = vsel %vm864_vm4, %v863_v23, %v858_v28 }
 0x252   :  { %867 = vst [vmem:[#allocation8] sm:$0x1] %v865_v29 }
 0x253   :  { %1184 = shalt.err (!%p1181_p0)
}
 0x254   :  { %s1185_s6 = scalar_lea.hbm %s1446_s4, 16 }
 0x255   :  { %p1186_p1 = scmp.ne.s32.totalorder %s1446_s4, %s1185_s6  ;;  %p1189_p2 = scmp.lt.u32.totalorder %s1185_s6, %s1446_s4 }
 0x257   :  { %p1191_p3 = pnand %p1189_p2, %p1186_p1 }
 0x259   :  { %1194 = shalt.err (!%p1191_p3)
}
 0x25a   :  { %877 = dma.vmem_to_hbm [thread:$0]  %s875_s3, 16, %s1446_s4, [#allocation4]  }
 0x25b   :  { %1199 = dma.done.wait [#allocation4], 16  }
 0x25c   :  { %1200 = vsyncadd [#allocation4], 4294967280 }
 0x25d   :  { %881 = vsyncpa [#allocation3], 1 }
 0x25e   :  { %882 = vsyncpa [#allocation6], 1 }
 0x25f   :  { %883 = vsyncpa [#allocation4], 1 }

</bundles_post_ra>
